<compile_context>
chip_gen: v5e
topology: v5e:2x2
jax: 0.10.0
libtpu: 0.0.40
codegen_flags: <defaults>
</compile_context>

<pallas_src>
import functools
import math

import jax
import jax.numpy as jnp
from jax import lax
from jax.experimental import pallas as pl
from jax.experimental.pallas import tpu as pltpu


VMEM_LIMIT_BYTES = 48 * 1024 * 1024     # <= ~48 MiB: headroom under v7x's 64 MiB physical
FUSED_VMEM_BUDGET = 20 * 1024 * 1024    # gate for the fully-fused single-kernel path


def _pick_tile(dim, candidates):
    """Largest candidate tile that evenly divides `dim`, else the full dim."""
    for c in candidates:
        if c <= dim and dim % c == 0:
            return c
    return dim


# ----------------------------- linear kernel ------------------------------ #
def _linear_kernel(x_ref, w_ref, b_ref, o_ref, acc_ref):
    kk = pl.program_id(2)

    @pl.when(kk == 0)
    def _():
        acc_ref[...] = jnp.zeros_like(acc_ref)

    # x / w are already stored in the compute dtype (f32 or bf16); f32 accumulation.
    acc_ref[...] += jnp.dot(x_ref[...], w_ref[...],
                            preferred_element_type=jnp.float32)

    @pl.when(kk == pl.num_programs(2) - 1)
    def _():
        o_ref[...] = (acc_ref[...] + b_ref[...]).astype(o_ref.dtype)


def linear(x2d, wt, b):
    """y = x2d @ wt + b, with wt already (d_in, d_out), pre-transposed once."""
    n, d_in = x2d.shape
    d_out = wt.shape[1]
    b2 = b.reshape(1, d_out).astype(jnp.float32)

    # Larger tiles amortize the ~0.35 us/step pipeline overhead and keep the
    # 256-deep v6e/v7x MXU fed; fallbacks handle small dims (full-dim blocks).
    tm = _pick_tile(n, (1024, 512, 256, 128))
    tn = _pick_tile(d_out, (512, 256, 128))
    tk = _pick_tile(d_in, (512, 256, 128))
    grid = (n // tm, d_out // tn, d_in // tk)  # reduction axis (K) last

    return pl.pallas_call(
        _linear_kernel,
        out_shape=jax.ShapeDtypeStruct((n, d_out), x2d.dtype),
        grid=grid,
        in_specs=[
            pl.BlockSpec((tm, tk), lambda i, j, k: (i, k)),
            pl.BlockSpec((tk, tn), lambda i, j, k: (k, j)),
            pl.BlockSpec((1, tn), lambda i, j, k: (0, j)),
        ],
        out_specs=pl.BlockSpec((tm, tn), lambda i, j, k: (i, j)),
        scratch_shapes=[pltpu.VMEM((tm, tn), jnp.float32)],
        compiler_params=pltpu.CompilerParams(
            dimension_semantics=("parallel", "parallel", "arbitrary"),
            vmem_limit_bytes=VMEM_LIMIT_BYTES,
        ),
    )(x2d, wt, b2)


# --------------------- scaled dot-product attention ----------------------- #
def _attn_kernel(m_ref, q_ref, k_ref, v_ref, ctx_ref, att_ref):
    # One grid step = one (batch, q-tile, head) block.  Per-head blocks arrive
    # lane-dense at lane 0 via BlockSpec; the mask block is resident across the
    # (innermost) head axis.
    q = q_ref[0, 0]                     # (tq, dk); 1/sqrt(dk) already folded into WQ
    k = k_ref[0, 0]                     # (Sk, dk)
    v = v_ref[0, 0]                     # (Sk, dv)
    masked = m_ref[0] != 0              # (tq, Sk) bool, nonzero == masked

    # scores = q @ k.T, f32 accumulation on the MXU.
    s = lax.dot_general(q, k, (((1,), (1,)), ((), ())),
                        preferred_element_type=jnp.float32)          # (tq, Sk)
    # Exact masked_fill semantics (matches the reference for fully-masked rows).
    s = jnp.where(masked, jnp.float32(-1e9), s)

    s_max = jnp.max(s, axis=-1, keepdims=True)
    e = jnp.exp(s - s_max)
    denom = jnp.sum(e, axis=-1, keepdims=True)
    # EUP approx reciprocal + one Newton step on the (tq, 1) column (denom >= 1).
    r = pl.reciprocal(denom, approx=True)
    r = r * (jnp.float32(2.0) - denom * r)
    att = e * r                                                      # (tq, Sk)

    att_ref[0, 0] = att.astype(att_ref.dtype)
    ctx_ref[0, 0] = jnp.dot(att.astype(v.dtype), v,
                            preferred_element_type=jnp.float32).astype(ctx_ref.dtype)


def _attn_q_tile(Sq, Sk, dk, dv, itemsize):
    """Pick a q-tile so the per-step VMEM working set stays well under the limit."""
    budget = 40 * 1024 * 1024
    for tq in (512, 256, 128, 64, 32):          # multiples of 32: safe for int8 mask tiling
        if tq > Sq or Sq % tq:
            continue
        step = (2 * (tq * dk + Sk * dk + Sk * dv) * itemsize   # q, k, v (double-buffered)
                + 2 * tq * Sk                                  # int8 mask
                + 2 * (tq * dv + tq * Sk) * itemsize           # ctx + att output blocks
                + 4 * tq * Sk * 4)                             # f32 scores/exp working set
        if step <= budget:
            return tq
    return Sq   # small (or indivisible) Sq: single full-Sq block


def scaled_dot_product_attention(q, k, v, mask_i8, *, att_dtype):
    """q: (B,H,Sq,dk), k: (B,H,Sk,dk), v: (B,H,Sk,dv), mask_i8: (B,Sq,Sk) (1=masked)."""
    B, H, Sq, dk = q.shape
    Sk, dv = v.shape[2], v.shape[3]
    tq = _attn_q_tile(Sq, Sk, dk, dv, q.dtype.itemsize)
    grid = (B, Sq // tq, H)                     # head axis innermost ("arbitrary")

    ctx, att = pl.pallas_call(
        _attn_kernel,
        out_shape=(
            jax.ShapeDtypeStruct((B, H, Sq, dv), q.dtype),
            jax.ShapeDtypeStruct((B, H, Sq, Sk), att_dtype),
        ),
        grid=grid,
        in_specs=[
            # mask index_map ignores h -> block stays resident across heads.
            pl.BlockSpec((1, tq, Sk), lambda b, qi, h: (b, qi, 0)),
            pl.BlockSpec((1, 1, tq, dk), lambda b, qi, h: (b, h, qi, 0)),
            pl.BlockSpec((1, 1, Sk, dk), lambda b, qi, h: (b, h, 0, 0)),
            pl.BlockSpec((1, 1, Sk, dv), lambda b, qi, h: (b, h, 0, 0)),
        ],
        out_specs=(
            pl.BlockSpec((1, 1, tq, dv), lambda b, qi, h: (b, h, qi, 0)),
            pl.BlockSpec((1, 1, tq, Sk), lambda b, qi, h: (b, h, qi, 0)),
        ),
        compiler_params=pltpu.CompilerParams(
            dimension_semantics=("parallel", "parallel", "arbitrary"),
            vmem_limit_bytes=VMEM_LIMIT_BYTES,
        ),
    )(mask_i8, q, k, v)
    return ctx, att


# ------------------- fully-fused MultiHead (small/medium) ------------------ #
def _fused_kernel(m_ref, xq_ref, xk_ref, xv_ref, wq_ref, wk_ref, wv_ref, wo_ref,
                  bq_ref, bk_ref, bv_ref, bo_ref, out_ref, att_ref, ctx_scr,
                  *, H, dk, dv):
    cdt = xq_ref.dtype
    # QKV projections (weights resident in VMEM across the whole grid).
    q = (jnp.dot(xq_ref[0], wq_ref[...], preferred_element_type=jnp.float32)
         + bq_ref[...]).astype(cdt)                                   # (Sq, H*dk)
    k = (jnp.dot(xk_ref[0], wk_ref[...], preferred_element_type=jnp.float32)
         + bk_ref[...]).astype(cdt)
    v = (jnp.dot(xv_ref[0], wv_ref[...], preferred_element_type=jnp.float32)
         + bv_ref[...]).astype(cdt)
    masked = m_ref[0] != 0                                            # (Sq, Sk)

    # Static head loop: fused path is only selected when H*Sq*Sk comfortably
    # fits VMEM, so the unrolled loop / narrow slices are cheap here.
    for h in range(H):
        s = lax.dot_general(q[:, h * dk:(h + 1) * dk], k[:, h * dk:(h + 1) * dk],
                            (((1,), (1,)), ((), ())),
                            preferred_element_type=jnp.float32)       # (Sq, Sk)
        s = jnp.where(masked, jnp.float32(-1e9), s)
        s_max = jnp.max(s, axis=-1, keepdims=True)
        e = jnp.exp(s - s_max)
        denom = jnp.sum(e, axis=-1, keepdims=True)
        r = pl.reciprocal(denom, approx=True)
        r = r * (jnp.float32(2.0) - denom * r)
        att = e * r
        att_ref[0, h] = att.astype(att_ref.dtype)
        ctx = jnp.dot(att.astype(cdt), v[:, h * dv:(h + 1) * dv],
                      preferred_element_type=jnp.float32)             # (Sq, dv)
        ctx_scr[:, h * dv:(h + 1) * dv] = ctx.astype(cdt)

    out = (jnp.dot(ctx_scr[...], wo_ref[...], preferred_element_type=jnp.float32)
           + bo_ref[...])
    out_ref[0] = out.astype(out_ref.dtype)


def _fused_fits_vmem(Sq, Sk, dm, H, dk, dv, itemsize):
    weights = ((2 * dm * H * dk + dm * H * dv + H * dv * dm) * itemsize
               + (2 * H * dk + H * dv + dm) * 4)
    per_step = ((Sq + 2 * Sk) * dm * itemsize            # Q/K/V input blocks
                + Sq * Sk                                # int8 mask
                + (Sq * H * dk + Sk * H * (dk + dv)) * 4 # projected q/k/v live values
                + 4 * Sq * Sk * 4                        # f32 scores/exp working set
                + H * Sq * Sk * itemsize                 # att output block
                + Sq * H * dv * itemsize                 # ctx scratch
                + Sq * dm * itemsize)                    # out block
    return weights + 2 * per_step <= FUSED_VMEM_BUDGET


def multihead_fused(Qc, Kc, Vc, mask_i8, params, *, att_dtype):
    B, Sq, dm = Qc.shape
    Sk = Kc.shape[1]
    H, dk, dv = params["heads"], params["dk"], params["dv"]
    kernel = functools.partial(_fused_kernel, H=H, dk=dk, dv=dv)

    bq2 = params["WQ_b"].reshape(1, -1)
    bk2 = params["WK_b"].reshape(1, -1)
    bv2 = params["WV_b"].reshape(1, -1)
    bo2 = params["lin_b"].reshape(1, -1)

    out, att = pl.pallas_call(
        kernel,
        out_shape=(
            jax.ShapeDtypeStruct((B, Sq, dm), Qc.dtype),
            jax.ShapeDtypeStruct((B, H, Sq, Sk), att_dtype),
        ),
        grid=(B,),
        in_specs=[
            pl.BlockSpec((1, Sq, Sk), lambda b: (b, 0, 0)),      # mask
            pl.BlockSpec((1, Sq, dm), lambda b: (b, 0, 0)),      # Q
            pl.BlockSpec((1, Sk, dm), lambda b: (b, 0, 0)),      # K
            pl.BlockSpec((1, Sk, dm), lambda b: (b, 0, 0)),      # V
            pl.BlockSpec((dm, H * dk), lambda b: (0, 0)),        # WQt (resident)
            pl.BlockSpec((dm, H * dk), lambda b: (0, 0)),        # WKt
            pl.BlockSpec((dm, H * dv), lambda b: (0, 0)),        # WVt
            pl.BlockSpec((H * dv, dm), lambda b: (0, 0)),        # WOt
            pl.BlockSpec((1, H * dk), lambda b: (0, 0)),
            pl.BlockSpec((1, H * dk), lambda b: (0, 0)),
            pl.BlockSpec((1, H * dv), lambda b: (0, 0)),
            pl.BlockSpec((1, dm), lambda b: (0, 0)),
        ],
        out_specs=(
            pl.BlockSpec((1, Sq, dm), lambda b: (b, 0, 0)),
            pl.BlockSpec((1, H, Sq, Sk), lambda b: (b, 0, 0, 0)),
        ),
        scratch_shapes=[pltpu.VMEM((Sq, H * dv), Qc.dtype)],     # lane-dense ctx slab
        compiler_params=pltpu.CompilerParams(
            dimension_semantics=("parallel",),
            vmem_limit_bytes=VMEM_LIMIT_BYTES,
        ),
    )(mask_i8, Qc, Kc, Vc,
      params["WQ_wt"], params["WK_wt"], params["WV_wt"], params["lin_wt"],
      bq2, bk2, bv2, bo2)
    return out, att


# ------------------------------ MultiHead ---------------------------------- #
def make_params(WQ_w, WQ_b, WK_w, WK_b, WV_w, WV_b, lin_w, lin_b,
                *, n_heads, d_k, d_v, compute_dtype=jnp.float32):
    """Pre-transpose weights once, fold 1/sqrt(dk) into WQ/bq, cast to compute dtype."""
    scale = 1.0 / math.sqrt(d_k)
    return dict(
        heads=n_heads, dk=d_k, dv=d_v, compute_dtype=compute_dtype,
        WQ_wt=(WQ_w.T * scale).astype(compute_dtype),
        WK_wt=WK_w.T.astype(compute_dtype),
        WV_wt=WV_w.T.astype(compute_dtype),
        lin_wt=lin_w.T.astype(compute_dtype),
        WQ_b=(WQ_b * scale).astype(jnp.float32),   # biases stay f32 (tiny DMA)
        WK_b=WK_b.astype(jnp.float32),
        WV_b=WV_b.astype(jnp.float32),
        lin_b=lin_b.astype(jnp.float32),
    )


def multihead_forward(params, Q, K, V, mask, *, path="auto"):
    cdt = params["compute_dtype"]
    H, dk, dv = params["heads"], params["dk"], params["dv"]
    B, Sq, dm = Q.shape
    Sk = K.shape[1]

    Qc, Kc, Vc = Q.astype(cdt), K.astype(cdt), V.astype(cdt)
    mask_i8 = (mask != 0).astype(jnp.int8)        # any nonzero == masked (bool semantics)
    att_dtype = cdt                               # bf16 att halves the largest HBM stream

    itemsize = jnp.dtype(cdt).itemsize
    use_fused = path == "fused" or (
        path == "auto" and _fused_fits_vmem(Sq, Sk, dm, H, dk, dv, itemsize))

    if use_fused:
        return multihead_fused(Qc, Kc, Vc, mask_i8, params, att_dtype=att_dtype)

    # General (split) path: tiled linears + head-gridded attention.
    q = linear(Qc.reshape(B * Sq, dm), params["WQ_wt"], params["WQ_b"])
    k = linear(Kc.reshape(B * Sk, dm), params["WK_wt"], params["WK_b"])
    v = linear(Vc.reshape(B * Sk, dm), params["WV_wt"], params["WV_b"])
    q = q.reshape(B, Sq, H, dk).transpose(0, 2, 1, 3)
    k = k.reshape(B, Sk, H, dk).transpose(0, 2, 1, 3)
    v = v.reshape(B, Sk, H, dv).transpose(0, 2, 1, 3)

    ctx, att = scaled_dot_product_attention(q, k, v, mask_i8, att_dtype=att_dtype)

    ctx2 = ctx.transpose(0, 2, 1, 3).reshape(B * Sq, H * dv)   # lane-dense (H*dv) slab
    out = linear(ctx2, params["lin_wt"], params["lin_b"]).reshape(B, Sq, dm)
    return out, att


# ------------------------- pure-JAX reference ------------------------------ #
def multihead_reference(p, Q, K, V, mask):
    B, Sq, dm = Q.shape
    Sk = K.shape[1]
    H, dk, dv = p["heads"], p["dk"], p["dv"]
    lin = lambda x, w, b: x @ w.T + b
    q = lin(Q, p["WQ_w"], p["WQ_b"]).reshape(B, Sq, H, dk).transpose(0, 2, 1, 3)
    k = lin(K, p["WK_w"], p["WK_b"]).reshape(B, Sk, H, dk).transpose(0, 2, 1, 3)
    v = lin(V, p["WV_w"], p["WV_b"]).reshape(B, Sk, H, dv).transpose(0, 2, 1, 3)
    w = jnp.einsum("bhqd,bhkd->bhqk", q, k) / jnp.sqrt(jnp.float32(dk))
    m = mask[:, None, :, :] != 0
    w = jnp.where(m, jnp.float32(-1e9), w)
    att = jax.nn.softmax(w, axis=-1)
    ctx = jnp.einsum("bhqk,bhkd->bhqd", att, v)
    ctx = ctx.transpose(0, 2, 1, 3).reshape(B, Sq, H * dv)
    out = lin(ctx, p["lin_w"], p["lin_b"])
    return out, att


# --------------------------------- main ------------------------------------ #
if __name__ == "__main__":
    B, S, d_model, n_heads, d_k, d_v = 2, 8, 32, 4, 8, 8

    key = jax.random.PRNGKey(0)
    keys = jax.random.split(key, 12)

    def init_linear(kw, kb, d_out, d_in):
        bound = 1.0 / math.sqrt(d_in)
        w = jax.random.uniform(kw, (d_out, d_in), jnp.float32, -bound, bound)
        b = jax.random.uniform(kb, (d_out,), jnp.float32, -bound, bound)
        return w, b

    WQ_w, WQ_b = init_linear(keys[0], keys[1], d_k * n_heads, d_model)
    WK_w, WK_b = init_linear(keys[2], keys[3], d_k * n_heads, d_model)
    WV_w, WV_b = init_linear(keys[4], keys[5], d_v * n_heads, d_model)
    lin_w, lin_b = init_linear(keys[6], keys[7], d_model, d_v * n_heads)

    raw = dict(WQ_w=WQ_w, WQ_b=WQ_b, WK_w=WK_w, WK_b=WK_b, WV_w=WV_w, WV_b=WV_b,
               lin_w=lin_w, lin_b=lin_b, heads=n_heads, dk=d_k, dv=d_v)

    Q = jax.random.normal(keys[8], (B, S, d_model), jnp.float32)
    K = jax.random.normal(keys[9], (B, S, d_model), jnp.float32)
    V = jax.random.normal(keys[10], (B, S, d_model), jnp.float32)
    mask = (jax.random.uniform(keys[11], (B, S, S)) < 0.2).astype(jnp.float32)

    ref_out, ref_att = multihead_reference(raw, Q, K, V, mask)

    # f32 path: correctness reference for both the fused and the split kernels.
    p32 = make_params(WQ_w, WQ_b, WK_w, WK_b, WV_w, WV_b, lin_w, lin_b,
                      n_heads=n_heads, d_k=d_k, d_v=d_v, compute_dtype=jnp.float32)
    for path in ("fused", "split"):
        out, att = jax.block_until_ready(multihead_forward(p32, Q, K, V, mask, path=path))
        assert jnp.allclose(out, ref_out, atol=2e-3, rtol=2e-3), f"f32 {path}: out mismatch"
        assert jnp.allclose(att.astype(jnp.float32), ref_att, atol=5e-4, rtol=1e-3), \
            f"f32 {path}: att mismatch"

    # bf16 path: bf16 weights/activations/att stored in HBM, f32 accumulation & softmax.
    p16 = make_params(WQ_w, WQ_b, WK_w, WK_b, WV_w, WV_b, lin_w, lin_b,
                      n_heads=n_heads, d_k=d_k, d_v=d_v, compute_dtype=jnp.bfloat16)
    for path in ("fused", "split"):
        out16, att16 = jax.block_until_ready(multihead_forward(p16, Q, K, V, mask, path=path))
        assert jnp.allclose(out16.astype(jnp.float32), ref_out, atol=1.5e-1, rtol=1.5e-1), \
            f"bf16 {path}: out mismatch"
        assert jnp.allclose(att16.astype(jnp.float32), ref_att, atol=7.5e-2, rtol=7.5e-2), \
            f"bf16 {path}: att mismatch"

    print("KERNEL_OK")
</pallas_src>

<mosaic_0001>
module attributes {stable_mosaic.version = 11 : i64} {
  func.func @_fused_kernel(%arg0: i32, %arg1: memref<1x8x8xi8, #tpu.memory_space<vmem>>, %arg2: memref<1x8x32xf32, #tpu.memory_space<vmem>>, %arg3: memref<1x8x32xf32, #tpu.memory_space<vmem>>, %arg4: memref<1x8x32xf32, #tpu.memory_space<vmem>>, %arg5: memref<32x32xf32, #tpu.memory_space<vmem>>, %arg6: memref<32x32xf32, #tpu.memory_space<vmem>>, %arg7: memref<32x32xf32, #tpu.memory_space<vmem>>, %arg8: memref<32x32xf32, #tpu.memory_space<vmem>>, %arg9: memref<1x32xf32, #tpu.memory_space<vmem>>, %arg10: memref<1x32xf32, #tpu.memory_space<vmem>>, %arg11: memref<1x32xf32, #tpu.memory_space<vmem>>, %arg12: memref<1x32xf32, #tpu.memory_space<vmem>>, %arg13: memref<1x8x32xf32, #tpu.memory_space<vmem>>, %arg14: memref<1x4x8x8xf32, #tpu.memory_space<vmem>>, %arg15: memref<8x32xf32, #tpu.memory_space<vmem>>) attributes {dimension_semantics = [#tpu.dimension_semantics<parallel>], iteration_bounds = array<i64: 2>, scalar_prefetch = 0 : i64, scratch_operands = 1 : i64, tpu.core_type = #tpu.core_type<tc>, window_params = [{transform_indices = @transform_0, window_bounds = array<i64: 1, 8, 8>}, {transform_indices = @transform_1, window_bounds = array<i64: 1, 8, 32>}, {transform_indices = @transform_2, window_bounds = array<i64: 1, 8, 32>}, {transform_indices = @transform_3, window_bounds = array<i64: 1, 8, 32>}, {pipeline_mode = #tpu.pipeline_mode<synchronous>, transform_indices = @transform_4, window_bounds = array<i64: 32, 32>}, {pipeline_mode = #tpu.pipeline_mode<synchronous>, transform_indices = @transform_5, window_bounds = array<i64: 32, 32>}, {pipeline_mode = #tpu.pipeline_mode<synchronous>, transform_indices = @transform_6, window_bounds = array<i64: 32, 32>}, {pipeline_mode = #tpu.pipeline_mode<synchronous>, transform_indices = @transform_7, window_bounds = array<i64: 32, 32>}, {pipeline_mode = #tpu.pipeline_mode<synchronous>, transform_indices = @transform_8, window_bounds = array<i64: 1, 32>}, {pipeline_mode = #tpu.pipeline_mode<synchronous>, transform_indices = @transform_9, window_bounds = array<i64: 1, 32>}, {pipeline_mode = #tpu.pipeline_mode<synchronous>, transform_indices = @transform_10, window_bounds = array<i64: 1, 32>}, {pipeline_mode = #tpu.pipeline_mode<synchronous>, transform_indices = @transform_11, window_bounds = array<i64: 1, 32>}, {transform_indices = @transform_12, window_bounds = array<i64: 1, 8, 32>}, {transform_indices = @transform_13, window_bounds = array<i64: 1, 4, 8, 8>}]} {
    %c0 = arith.constant 0 : index
    %c0_0 = arith.constant 0 : index
    %c0_1 = arith.constant 0 : index
    %0 = vector.load %arg2[%c0, %c0_0, %c0_1] : memref<1x8x32xf32, #tpu.memory_space<vmem>>, vector<1x8x32xf32>
    %1 = vector.shape_cast %0 : vector<1x8x32xf32> to vector<8x32xf32>
    %c0_2 = arith.constant 0 : index
    %c0_3 = arith.constant 0 : index
    %2 = vector.load %arg5[%c0_2, %c0_3] : memref<32x32xf32, #tpu.memory_space<vmem>>, vector<32x32xf32>
    %cst = arith.constant dense<0.000000e+00> : vector<8x32xf32>
    %3 = tpu.matmul %1, %2, %cst {dimension_numbers = #tpu.dot_dimension_numbers<[1], [0], [0], [1], [0, 0, 1, 1], [], []>} : vector<8x32xf32>, vector<32x32xf32>, vector<8x32xf32> -> vector<8x32xf32>
    %c0_4 = arith.constant 0 : index
    %c0_5 = arith.constant 0 : index
    %4 = vector.load %arg9[%c0_4, %c0_5] : memref<1x32xf32, #tpu.memory_space<vmem>>, vector<1x32xf32>
    %5 = vector.broadcast %4 : vector<1x32xf32> to vector<8x32xf32>
    %6 = arith.addf %3, %5 : vector<8x32xf32>
    %c0_6 = arith.constant 0 : index
    %c0_7 = arith.constant 0 : index
    %c0_8 = arith.constant 0 : index
    %7 = vector.load %arg3[%c0_6, %c0_7, %c0_8] : memref<1x8x32xf32, #tpu.memory_space<vmem>>, vector<1x8x32xf32>
    %8 = vector.shape_cast %7 : vector<1x8x32xf32> to vector<8x32xf32>
    %c0_9 = arith.constant 0 : index
    %c0_10 = arith.constant 0 : index
    %9 = vector.load %arg6[%c0_9, %c0_10] : memref<32x32xf32, #tpu.memory_space<vmem>>, vector<32x32xf32>
    %cst_11 = arith.constant dense<0.000000e+00> : vector<8x32xf32>
    %10 = tpu.matmul %8, %9, %cst_11 {dimension_numbers = #tpu.dot_dimension_numbers<[1], [0], [0], [1], [0, 0, 1, 1], [], []>} : vector<8x32xf32>, vector<32x32xf32>, vector<8x32xf32> -> vector<8x32xf32>
    %c0_12 = arith.constant 0 : index
    %c0_13 = arith.constant 0 : index
    %11 = vector.load %arg10[%c0_12, %c0_13] : memref<1x32xf32, #tpu.memory_space<vmem>>, vector<1x32xf32>
    %12 = vector.broadcast %11 : vector<1x32xf32> to vector<8x32xf32>
    %13 = arith.addf %10, %12 : vector<8x32xf32>
    %c0_14 = arith.constant 0 : index
    %c0_15 = arith.constant 0 : index
    %c0_16 = arith.constant 0 : index
    %14 = vector.load %arg4[%c0_14, %c0_15, %c0_16] : memref<1x8x32xf32, #tpu.memory_space<vmem>>, vector<1x8x32xf32>
    %15 = vector.shape_cast %14 : vector<1x8x32xf32> to vector<8x32xf32>
    %c0_17 = arith.constant 0 : index
    %c0_18 = arith.constant 0 : index
    %16 = vector.load %arg7[%c0_17, %c0_18] : memref<32x32xf32, #tpu.memory_space<vmem>>, vector<32x32xf32>
    %cst_19 = arith.constant dense<0.000000e+00> : vector<8x32xf32>
    %17 = tpu.matmul %15, %16, %cst_19 {dimension_numbers = #tpu.dot_dimension_numbers<[1], [0], [0], [1], [0, 0, 1, 1], [], []>} : vector<8x32xf32>, vector<32x32xf32>, vector<8x32xf32> -> vector<8x32xf32>
    %c0_20 = arith.constant 0 : index
    %c0_21 = arith.constant 0 : index
    %18 = vector.load %arg11[%c0_20, %c0_21] : memref<1x32xf32, #tpu.memory_space<vmem>>, vector<1x32xf32>
    %19 = vector.broadcast %18 : vector<1x32xf32> to vector<8x32xf32>
    %20 = arith.addf %17, %19 : vector<8x32xf32>
    %c0_22 = arith.constant 0 : index
    %c0_23 = arith.constant 0 : index
    %c0_24 = arith.constant 0 : index
    %21 = vector.load %arg1[%c0_22, %c0_23, %c0_24] : memref<1x8x8xi8, #tpu.memory_space<vmem>>, vector<1x8x8xi8>
    %22 = vector.shape_cast %21 : vector<1x8x8xi8> to vector<8x8xi8>
    %c0_i8 = arith.constant 0 : i8
    %23 = vector.broadcast %c0_i8 : i8 to vector<8x8xi8>
    %24 = arith.cmpi ne, %22, %23 : vector<8x8xi8>
    %25 = vector.extract_strided_slice %6 {offsets = [0, 0], sizes = [8, 8], strides = [1, 1]} : vector<8x32xf32> to vector<8x8xf32>
    %26 = vector.extract_strided_slice %13 {offsets = [0, 0], sizes = [8, 8], strides = [1, 1]} : vector<8x32xf32> to vector<8x8xf32>
    %cst_25 = arith.constant dense<0.000000e+00> : vector<8x8xf32>
    %27 = tpu.matmul %25, %26, %cst_25 {dimension_numbers = #tpu.dot_dimension_numbers<[1], [1], [0], [0], [0, 0, 1, 0], [], []>} : vector<8x8xf32>, vector<8x8xf32>, vector<8x8xf32> -> vector<8x8xf32>
    %cst_26 = arith.constant -1.000000e+09 : f32
    %28 = vector.broadcast %cst_26 : f32 to vector<8x8xf32>
    %29 = arith.select %24, %28, %27 : vector<8x8xi1>, vector<8x8xf32>
    %cst_27 = arith.constant dense<0xFF800000> : vector<8xf32>
    %30 = vector.multi_reduction <maximumf>, %29, %cst_27 [1] : vector<8x8xf32> to vector<8xf32>
    %31 = vector.shape_cast %30 : vector<8xf32> to vector<8x1xf32>
    %32 = vector.broadcast %31 : vector<8x1xf32> to vector<8x8xf32>
    %33 = arith.subf %29, %32 : vector<8x8xf32>
    %34 = math.exp %33 : vector<8x8xf32>
    %cst_28 = arith.constant dense<0.000000e+00> : vector<8xf32>
    %35 = vector.multi_reduction <add>, %34, %cst_28 [1] : vector<8x8xf32> to vector<8xf32>
    %36 = vector.shape_cast %35 : vector<8xf32> to vector<8x1xf32>
    %37 = tpu.reciprocal %36 {approx = true} : vector<8x1xf32> -> vector<8x1xf32>
    %38 = arith.mulf %36, %37 : vector<8x1xf32>
    %cst_29 = arith.constant 2.000000e+00 : f32
    %39 = vector.broadcast %cst_29 : f32 to vector<8x1xf32>
    %40 = arith.subf %39, %38 : vector<8x1xf32>
    %41 = arith.mulf %37, %40 : vector<8x1xf32>
    %42 = vector.broadcast %41 : vector<8x1xf32> to vector<8x8xf32>
    %43 = arith.mulf %34, %42 : vector<8x8xf32>
    %c0_30 = arith.constant 0 : index
    %c0_31 = arith.constant 0 : index
    %c0_32 = arith.constant 0 : index
    %c0_33 = arith.constant 0 : index
    %44 = vector.load %arg14[%c0_30, %c0_31, %c0_32, %c0_33] : memref<1x4x8x8xf32, #tpu.memory_space<vmem>>, vector<1x1x8x8xf32>
    %45 = vector.shape_cast %44 : vector<1x1x8x8xf32> to vector<8x8xf32>
    %46 = vector.shape_cast %43 : vector<8x8xf32> to vector<1x1x8x8xf32>
    tpu.vector_store %arg14[%c0_30, %c0_31, %c0_32, %c0_33], %46 {strides = array<i32>} : memref<1x4x8x8xf32, #tpu.memory_space<vmem>>, vector<1x1x8x8xf32>,
    %47 = vector.extract_strided_slice %20 {offsets = [0, 0], sizes = [8, 8], strides = [1, 1]} : vector<8x32xf32> to vector<8x8xf32>
    %cst_34 = arith.constant dense<0.000000e+00> : vector<8x8xf32>
    %48 = tpu.matmul %43, %47, %cst_34 {dimension_numbers = #tpu.dot_dimension_numbers<[1], [0], [0], [1], [0, 0, 1, 1], [], []>} : vector<8x8xf32>, vector<8x8xf32>, vector<8x8xf32> -> vector<8x8xf32>
    %c0_35 = arith.constant 0 : index
    %c0_36 = arith.constant 0 : index
    %49 = vector.load %arg15[%c0_35, %c0_36] : memref<8x32xf32, #tpu.memory_space<vmem>>, vector<8x8xf32>
    tpu.vector_store %arg15[%c0_35, %c0_36], %48 {strides = array<i32>} : memref<8x32xf32, #tpu.memory_space<vmem>>, vector<8x8xf32>,
    %50 = vector.extract_strided_slice %6 {offsets = [0, 8], sizes = [8, 8], strides = [1, 1]} : vector<8x32xf32> to vector<8x8xf32>
    %51 = vector.extract_strided_slice %13 {offsets = [0, 8], sizes = [8, 8], strides = [1, 1]} : vector<8x32xf32> to vector<8x8xf32>
    %cst_37 = arith.constant dense<0.000000e+00> : vector<8x8xf32>
    %52 = tpu.matmul %50, %51, %cst_37 {dimension_numbers = #tpu.dot_dimension_numbers<[1], [1], [0], [0], [0, 0, 1, 0], [], []>} : vector<8x8xf32>, vector<8x8xf32>, vector<8x8xf32> -> vector<8x8xf32>
    %cst_38 = arith.constant -1.000000e+09 : f32
    %53 = vector.broadcast %cst_38 : f32 to vector<8x8xf32>
    %54 = arith.select %24, %53, %52 : vector<8x8xi1>, vector<8x8xf32>
    %cst_39 = arith.constant dense<0xFF800000> : vector<8xf32>
    %55 = vector.multi_reduction <maximumf>, %54, %cst_39 [1] : vector<8x8xf32> to vector<8xf32>
    %56 = vector.shape_cast %55 : vector<8xf32> to vector<8x1xf32>
    %57 = vector.broadcast %56 : vector<8x1xf32> to vector<8x8xf32>
    %58 = arith.subf %54, %57 : vector<8x8xf32>
    %59 = math.exp %58 : vector<8x8xf32>
    %cst_40 = arith.constant dense<0.000000e+00> : vector<8xf32>
    %60 = vector.multi_reduction <add>, %59, %cst_40 [1] : vector<8x8xf32> to vector<8xf32>
    %61 = vector.shape_cast %60 : vector<8xf32> to vector<8x1xf32>
    %62 = tpu.reciprocal %61 {approx = true} : vector<8x1xf32> -> vector<8x1xf32>
    %63 = arith.mulf %61, %62 : vector<8x1xf32>
    %cst_41 = arith.constant 2.000000e+00 : f32
    %64 = vector.broadcast %cst_41 : f32 to vector<8x1xf32>
    %65 = arith.subf %64, %63 : vector<8x1xf32>
    %66 = arith.mulf %62, %65 : vector<8x1xf32>
    %67 = vector.broadcast %66 : vector<8x1xf32> to vector<8x8xf32>
    %68 = arith.mulf %59, %67 : vector<8x8xf32>
    %c0_42 = arith.constant 0 : index
    %c1 = arith.constant 1 : index
    %c0_43 = arith.constant 0 : index
    %c0_44 = arith.constant 0 : index
    %69 = vector.load %arg14[%c0_42, %c1, %c0_43, %c0_44] : memref<1x4x8x8xf32, #tpu.memory_space<vmem>>, vector<1x1x8x8xf32>
    %70 = vector.shape_cast %69 : vector<1x1x8x8xf32> to vector<8x8xf32>
    %71 = vector.shape_cast %68 : vector<8x8xf32> to vector<1x1x8x8xf32>
    tpu.vector_store %arg14[%c0_42, %c1, %c0_43, %c0_44], %71 {strides = array<i32>} : memref<1x4x8x8xf32, #tpu.memory_space<vmem>>, vector<1x1x8x8xf32>,
    %72 = vector.extract_strided_slice %20 {offsets = [0, 8], sizes = [8, 8], strides = [1, 1]} : vector<8x32xf32> to vector<8x8xf32>
    %cst_45 = arith.constant dense<0.000000e+00> : vector<8x8xf32>
    %73 = tpu.matmul %68, %72, %cst_45 {dimension_numbers = #tpu.dot_dimension_numbers<[1], [0], [0], [1], [0, 0, 1, 1], [], []>} : vector<8x8xf32>, vector<8x8xf32>, vector<8x8xf32> -> vector<8x8xf32>
    %c0_46 = arith.constant 0 : index
    %c8 = arith.constant 8 : index
    %74 = vector.load %arg15[%c0_46, %c8] : memref<8x32xf32, #tpu.memory_space<vmem>>, vector<8x8xf32>
    tpu.vector_store %arg15[%c0_46, %c8], %73 {strides = array<i32>} : memref<8x32xf32, #tpu.memory_space<vmem>>, vector<8x8xf32>,
    %75 = vector.extract_strided_slice %6 {offsets = [0, 16], sizes = [8, 8], strides = [1, 1]} : vector<8x32xf32> to vector<8x8xf32>
    %76 = vector.extract_strided_slice %13 {offsets = [0, 16], sizes = [8, 8], strides = [1, 1]} : vector<8x32xf32> to vector<8x8xf32>
    %cst_47 = arith.constant dense<0.000000e+00> : vector<8x8xf32>
    %77 = tpu.matmul %75, %76, %cst_47 {dimension_numbers = #tpu.dot_dimension_numbers<[1], [1], [0], [0], [0, 0, 1, 0], [], []>} : vector<8x8xf32>, vector<8x8xf32>, vector<8x8xf32> -> vector<8x8xf32>
    %cst_48 = arith.constant -1.000000e+09 : f32
    %78 = vector.broadcast %cst_48 : f32 to vector<8x8xf32>
    %79 = arith.select %24, %78, %77 : vector<8x8xi1>, vector<8x8xf32>
    %cst_49 = arith.constant dense<0xFF800000> : vector<8xf32>
    %80 = vector.multi_reduction <maximumf>, %79, %cst_49 [1] : vector<8x8xf32> to vector<8xf32>
    %81 = vector.shape_cast %80 : vector<8xf32> to vector<8x1xf32>
    %82 = vector.broadcast %81 : vector<8x1xf32> to vector<8x8xf32>
    %83 = arith.subf %79, %82 : vector<8x8xf32>
    %84 = math.exp %83 : vector<8x8xf32>
    %cst_50 = arith.constant dense<0.000000e+00> : vector<8xf32>
    %85 = vector.multi_reduction <add>, %84, %cst_50 [1] : vector<8x8xf32> to vector<8xf32>
    %86 = vector.shape_cast %85 : vector<8xf32> to vector<8x1xf32>
    %87 = tpu.reciprocal %86 {approx = true} : vector<8x1xf32> -> vector<8x1xf32>
    %88 = arith.mulf %86, %87 : vector<8x1xf32>
    %cst_51 = arith.constant 2.000000e+00 : f32
    %89 = vector.broadcast %cst_51 : f32 to vector<8x1xf32>
    %90 = arith.subf %89, %88 : vector<8x1xf32>
    %91 = arith.mulf %87, %90 : vector<8x1xf32>
    %92 = vector.broadcast %91 : vector<8x1xf32> to vector<8x8xf32>
    %93 = arith.mulf %84, %92 : vector<8x8xf32>
    %c0_52 = arith.constant 0 : index
    %c2 = arith.constant 2 : index
    %c0_53 = arith.constant 0 : index
    %c0_54 = arith.constant 0 : index
    %94 = vector.load %arg14[%c0_52, %c2, %c0_53, %c0_54] : memref<1x4x8x8xf32, #tpu.memory_space<vmem>>, vector<1x1x8x8xf32>
    %95 = vector.shape_cast %94 : vector<1x1x8x8xf32> to vector<8x8xf32>
    %96 = vector.shape_cast %93 : vector<8x8xf32> to vector<1x1x8x8xf32>
    tpu.vector_store %arg14[%c0_52, %c2, %c0_53, %c0_54], %96 {strides = array<i32>} : memref<1x4x8x8xf32, #tpu.memory_space<vmem>>, vector<1x1x8x8xf32>,
    %97 = vector.extract_strided_slice %20 {offsets = [0, 16], sizes = [8, 8], strides = [1, 1]} : vector<8x32xf32> to vector<8x8xf32>
    %cst_55 = arith.constant dense<0.000000e+00> : vector<8x8xf32>
    %98 = tpu.matmul %93, %97, %cst_55 {dimension_numbers = #tpu.dot_dimension_numbers<[1], [0], [0], [1], [0, 0, 1, 1], [], []>} : vector<8x8xf32>, vector<8x8xf32>, vector<8x8xf32> -> vector<8x8xf32>
    %c0_56 = arith.constant 0 : index
    %c16 = arith.constant 16 : index
    %99 = vector.load %arg15[%c0_56, %c16] : memref<8x32xf32, #tpu.memory_space<vmem>>, vector<8x8xf32>
    tpu.vector_store %arg15[%c0_56, %c16], %98 {strides = array<i32>} : memref<8x32xf32, #tpu.memory_space<vmem>>, vector<8x8xf32>,
    %100 = vector.extract_strided_slice %6 {offsets = [0, 24], sizes = [8, 8], strides = [1, 1]} : vector<8x32xf32> to vector<8x8xf32>
    %101 = vector.extract_strided_slice %13 {offsets = [0, 24], sizes = [8, 8], strides = [1, 1]} : vector<8x32xf32> to vector<8x8xf32>
    %cst_57 = arith.constant dense<0.000000e+00> : vector<8x8xf32>
    %102 = tpu.matmul %100, %101, %cst_57 {dimension_numbers = #tpu.dot_dimension_numbers<[1], [1], [0], [0], [0, 0, 1, 0], [], []>} : vector<8x8xf32>, vector<8x8xf32>, vector<8x8xf32> -> vector<8x8xf32>
    %cst_58 = arith.constant -1.000000e+09 : f32
    %103 = vector.broadcast %cst_58 : f32 to vector<8x8xf32>
    %104 = arith.select %24, %103, %102 : vector<8x8xi1>, vector<8x8xf32>
    %cst_59 = arith.constant dense<0xFF800000> : vector<8xf32>
    %105 = vector.multi_reduction <maximumf>, %104, %cst_59 [1] : vector<8x8xf32> to vector<8xf32>
    %106 = vector.shape_cast %105 : vector<8xf32> to vector<8x1xf32>
    %107 = vector.broadcast %106 : vector<8x1xf32> to vector<8x8xf32>
    %108 = arith.subf %104, %107 : vector<8x8xf32>
    %109 = math.exp %108 : vector<8x8xf32>
    %cst_60 = arith.constant dense<0.000000e+00> : vector<8xf32>
    %110 = vector.multi_reduction <add>, %109, %cst_60 [1] : vector<8x8xf32> to vector<8xf32>
    %111 = vector.shape_cast %110 : vector<8xf32> to vector<8x1xf32>
    %112 = tpu.reciprocal %111 {approx = true} : vector<8x1xf32> -> vector<8x1xf32>
    %113 = arith.mulf %111, %112 : vector<8x1xf32>
    %cst_61 = arith.constant 2.000000e+00 : f32
    %114 = vector.broadcast %cst_61 : f32 to vector<8x1xf32>
    %115 = arith.subf %114, %113 : vector<8x1xf32>
    %116 = arith.mulf %112, %115 : vector<8x1xf32>
    %117 = vector.broadcast %116 : vector<8x1xf32> to vector<8x8xf32>
    %118 = arith.mulf %109, %117 : vector<8x8xf32>
    %c0_62 = arith.constant 0 : index
    %c3 = arith.constant 3 : index
    %c0_63 = arith.constant 0 : index
    %c0_64 = arith.constant 0 : index
    %119 = vector.load %arg14[%c0_62, %c3, %c0_63, %c0_64] : memref<1x4x8x8xf32, #tpu.memory_space<vmem>>, vector<1x1x8x8xf32>
    %120 = vector.shape_cast %119 : vector<1x1x8x8xf32> to vector<8x8xf32>
    %121 = vector.shape_cast %118 : vector<8x8xf32> to vector<1x1x8x8xf32>
    tpu.vector_store %arg14[%c0_62, %c3, %c0_63, %c0_64], %121 {strides = array<i32>} : memref<1x4x8x8xf32, #tpu.memory_space<vmem>>, vector<1x1x8x8xf32>,
    %122 = vector.extract_strided_slice %20 {offsets = [0, 24], sizes = [8, 8], strides = [1, 1]} : vector<8x32xf32> to vector<8x8xf32>
    %cst_65 = arith.constant dense<0.000000e+00> : vector<8x8xf32>
    %123 = tpu.matmul %118, %122, %cst_65 {dimension_numbers = #tpu.dot_dimension_numbers<[1], [0], [0], [1], [0, 0, 1, 1], [], []>} : vector<8x8xf32>, vector<8x8xf32>, vector<8x8xf32> -> vector<8x8xf32>
    %c0_66 = arith.constant 0 : index
    %c24 = arith.constant 24 : index
    %124 = vector.load %arg15[%c0_66, %c24] : memref<8x32xf32, #tpu.memory_space<vmem>>, vector<8x8xf32>
    tpu.vector_store %arg15[%c0_66, %c24], %123 {strides = array<i32>} : memref<8x32xf32, #tpu.memory_space<vmem>>, vector<8x8xf32>,
    %c0_67 = arith.constant 0 : index
    %c0_68 = arith.constant 0 : index
    %125 = vector.load %arg15[%c0_67, %c0_68] : memref<8x32xf32, #tpu.memory_space<vmem>>, vector<8x32xf32>
    %c0_69 = arith.constant 0 : index
    %c0_70 = arith.constant 0 : index
    %126 = vector.load %arg8[%c0_69, %c0_70] : memref<32x32xf32, #tpu.memory_space<vmem>>, vector<32x32xf32>
    %cst_71 = arith.constant dense<0.000000e+00> : vector<8x32xf32>
    %127 = tpu.matmul %125, %126, %cst_71 {dimension_numbers = #tpu.dot_dimension_numbers<[1], [0], [0], [1], [0, 0, 1, 1], [], []>} : vector<8x32xf32>, vector<32x32xf32>, vector<8x32xf32> -> vector<8x32xf32>
    %c0_72 = arith.constant 0 : index
    %c0_73 = arith.constant 0 : index
    %128 = vector.load %arg12[%c0_72, %c0_73] : memref<1x32xf32, #tpu.memory_space<vmem>>, vector<1x32xf32>
    %129 = vector.broadcast %128 : vector<1x32xf32> to vector<8x32xf32>
    %130 = arith.addf %127, %129 : vector<8x32xf32>
    %c0_74 = arith.constant 0 : index
    %c0_75 = arith.constant 0 : index
    %c0_76 = arith.constant 0 : index
    %131 = vector.load %arg13[%c0_74, %c0_75, %c0_76] : memref<1x8x32xf32, #tpu.memory_space<vmem>>, vector<1x8x32xf32>
    %132 = vector.shape_cast %131 : vector<1x8x32xf32> to vector<8x32xf32>
    %133 = vector.shape_cast %130 : vector<8x32xf32> to vector<1x8x32xf32>
    tpu.vector_store %arg13[%c0_74, %c0_75, %c0_76], %133 {strides = array<i32>} : memref<1x8x32xf32, #tpu.memory_space<vmem>>, vector<1x8x32xf32>,
    return
  }
  func.func @transform_0(%arg0: i32) -> (i32, i32, i32) {
    %c0_i32 = arith.constant 0 : i32
    %c0_i32_0 = arith.constant 0 : i32
    %c0_i32_1 = arith.constant 0 : i32
    return %arg0, %c0_i32, %c0_i32_0 : i32, i32, i32
  }
  func.func @transform_1(%arg0: i32) -> (i32, i32, i32) {
    %c0_i32 = arith.constant 0 : i32
    %c0_i32_0 = arith.constant 0 : i32
    %c0_i32_1 = arith.constant 0 : i32
    return %arg0, %c0_i32, %c0_i32_0 : i32, i32, i32
  }
  func.func @transform_2(%arg0: i32) -> (i32, i32, i32) {
    %c0_i32 = arith.constant 0 : i32
    %c0_i32_0 = arith.constant 0 : i32
    %c0_i32_1 = arith.constant 0 : i32
    return %arg0, %c0_i32, %c0_i32_0 : i32, i32, i32
  }
  func.func @transform_3(%arg0: i32) -> (i32, i32, i32) {
    %c0_i32 = arith.constant 0 : i32
    %c0_i32_0 = arith.constant 0 : i32
    %c0_i32_1 = arith.constant 0 : i32
    return %arg0, %c0_i32, %c0_i32_0 : i32, i32, i32
  }
  func.func @transform_4(%arg0: i32) -> (i32, i32) {
    %c0_i32 = arith.constant 0 : i32
    %c0_i32_0 = arith.constant 0 : i32
    %c0_i32_1 = arith.constant 0 : i32
    return %c0_i32, %c0_i32_0 : i32, i32
  }
  func.func @transform_5(%arg0: i32) -> (i32, i32) {
    %c0_i32 = arith.constant 0 : i32
    %c0_i32_0 = arith.constant 0 : i32
    %c0_i32_1 = arith.constant 0 : i32
    return %c0_i32, %c0_i32_0 : i32, i32
  }
  func.func @transform_6(%arg0: i32) -> (i32, i32) {
    %c0_i32 = arith.constant 0 : i32
    %c0_i32_0 = arith.constant 0 : i32
    %c0_i32_1 = arith.constant 0 : i32
    return %c0_i32, %c0_i32_0 : i32, i32
  }
  func.func @transform_7(%arg0: i32) -> (i32, i32) {
    %c0_i32 = arith.constant 0 : i32
    %c0_i32_0 = arith.constant 0 : i32
    %c0_i32_1 = arith.constant 0 : i32
    return %c0_i32, %c0_i32_0 : i32, i32
  }
  func.func @transform_8(%arg0: i32) -> (i32, i32) {
    %c0_i32 = arith.constant 0 : i32
    %c0_i32_0 = arith.constant 0 : i32
    %c0_i32_1 = arith.constant 0 : i32
    return %c0_i32, %c0_i32_0 : i32, i32
  }
  func.func @transform_9(%arg0: i32) -> (i32, i32) {
    %c0_i32 = arith.constant 0 : i32
    %c0_i32_0 = arith.constant 0 : i32
    %c0_i32_1 = arith.constant 0 : i32
    return %c0_i32, %c0_i32_0 : i32, i32
  }
  func.func @transform_10(%arg0: i32) -> (i32, i32) {
    %c0_i32 = arith.constant 0 : i32
    %c0_i32_0 = arith.constant 0 : i32
    %c0_i32_1 = arith.constant 0 : i32
    return %c0_i32, %c0_i32_0 : i32, i32
  }
  func.func @transform_11(%arg0: i32) -> (i32, i32) {
    %c0_i32 = arith.constant 0 : i32
    %c0_i32_0 = arith.constant 0 : i32
    %c0_i32_1 = arith.constant 0 : i32
    return %c0_i32, %c0_i32_0 : i32, i32
  }
  func.func @transform_12(%arg0: i32) -> (i32, i32, i32) {
    %c0_i32 = arith.constant 0 : i32
    %c0_i32_0 = arith.constant 0 : i32
    %c0_i32_1 = arith.constant 0 : i32
    return %arg0, %c0_i32, %c0_i32_0 : i32, i32, i32
  }
  func.func @transform_13(%arg0: i32) -> (i32, i32, i32, i32) {
    %c0_i32 = arith.constant 0 : i32
    %c0_i32_0 = arith.constant 0 : i32
    %c0_i32_1 = arith.constant 0 : i32
    %c0_i32_2 = arith.constant 0 : i32
    return %arg0, %c0_i32, %c0_i32_0, %c0_i32_1 : i32, i32, i32, i32
  }
}

</mosaic_0001>

<bundles_post_ra>
// kernel: tpu_custom_call.1
= control target key start
LH: loop header
LB: loop body
LE: loop exit
PB: predicated region body
PF: predicated region fallthrough
CT: control target
= control target key end

     0   :  { %s2324_s0 = inlined_call_operand.hbm [shape: s8[2,8,8], index: 0, kind: input, shape index: {}]   ;;  %s2325_s1 = inlined_call_operand.hbm [shape: f32[2,8,32], index: 1, kind: input, shape index: {}]   ;;  %s2326_s2 = inlined_call_operand.hbm [shape: f32[2,8,32], index: 2, kind: input, shape index: {}]   ;;  %s2327_s3 = inlined_call_operand.hbm [shape: f32[2,8,32], index: 3, kind: input, shape index: {}]   ;;  %s2328_s4 = inlined_call_operand.hbm [shape: f32[32,32], index: 4, kind: input, shape index: {}]   ;;  %s2329_s5 = inlined_call_operand.hbm [shape: f32[32,32], index: 5, kind: input, shape index: {}]   ;;  %s2330_s6 = inlined_call_operand.hbm [shape: f32[32,32], index: 6, kind: input, shape index: {}]   ;;  %s2331_s7 = inlined_call_operand.hbm [shape: f32[32,32], index: 7, kind: input, shape index: {}]   ;;  %s2332_s8 = inlined_call_operand.vmem [shape: f32[1,32], index: 8, kind: input, shape index: {}]   ;;  %s2333_s9 = inlined_call_operand.vmem [shape: f32[1,32], index: 9, kind: input, shape index: {}]   ;;  %s2334_s10 = inlined_call_operand.vmem [shape: f32[1,32], index: 10, kind: input, shape index: {}]   ;;  %s2335_s11 = inlined_call_operand.vmem [shape: f32[1,32], index: 11, kind: input, shape index: {}]   ;;  %s2336_s12 = inlined_call_operand.hbm [shape: f32[2,8,32], index: 12, kind: output, shape index: {0}]   ;;  %s2337_s13 = inlined_call_operand.hbm [shape: f32[2,4,8,8], index: 13, kind: output, shape index: {1}]  }
   0x1   :  { %2353 = sst [smem:[#allocation34_spill]] %s2325_s1 }
   0x2   :  { %2354 = sst [smem:[#allocation35_spill]] %s2328_s4 }
   0x3   :  { %2355 = sst [smem:[#allocation36_spill]] %s2329_s5 }
   0x4   :  { %2356 = sst [smem:[#allocation37_spill]] %s2330_s6 }
   0x5   :  { %2357 = sst [smem:[#allocation38_spill]] %s2331_s7 }
   0x6   :  { %2358 = sst [smem:[#allocation39_spill]] %s2332_s8 }
   0x7   :  { %2359 = sst [smem:[#allocation40_spill]] %s2333_s9 }
   0x8   :  { %2360 = sst [smem:[#allocation41_spill]] %s2334_s10 }
   0x9   :  { %2361 = sst [smem:[#allocation42_spill]] %s2335_s11 }
   0xa   :  { %2362 = sst [smem:[#allocation43_spill]] %s2336_s12 }
   0xb   :  { %2363 = sst [smem:[#allocation44_spill]] %s2337_s13 }
   0xc   :  { %19 = vsyncpa [#allocation4], 0 }
   0xd   :  { %21 = vsyncpa [#allocation4 + $0x1], 0 }
   0xe   :  { %22 = vsyncpa [#allocation7], 0 }
   0xf   :  { %24 = vsyncpa [#allocation7 + $0x1], 0 }
  0x10   :  { %25 = vsyncpa [#allocation10], 0 }
  0x11   :  { %27 = vsyncpa [#allocation10 + $0x1], 0 }
  0x12   :  { %28 = vsyncpa [#allocation13], 0 }
  0x13   :  { %29 = vsyncpa [#allocation16], 0 }
  0x14   :  { %30 = vsyncpa [#allocation5], 0 }
  0x15   :  { %32 = vsyncpa [#allocation5 + $0x1], 0 }
  0x16   :  { %33 = vsyncpa [#allocation19], 0 }
  0x17   :  { %35 = vsyncpa [#allocation19 + $0x1], 0  ;;  %s1964_s25 = smov 0   ;;  %s1966_s26 = smov 0  }
  0x18   :  { %s1968_s27 = smov 0   ;;  %s1970_s28 = smov 0  }
  0x19 LB: > { %2364 = sst [smem:[#allocation28_spill]] %s1866_s25  ;;  %s1985_s29 = sadd.s32 4294967295, %s1878_s28   ;;  %s1878_s28 = sphi %s1970_s28, %s2402_s28   ;;  %s1874_s27 = sphi %s1968_s27, %s2404_s27   ;;  %s1870_s26 = sphi %s1966_s26, %s2406_s26   ;;  %s1866_s25 = sphi %s1964_s25, %s2405_s25  }
  0x1a   : > { %2365 = sst [smem:[#allocation29_spill]] %s1874_s27  ;;  %s1330_s30 = sadd.s32 4294967294, %s1878_s28  }
  0x1b   : > { %p61_p0 = scmp.ne.s32.totalorder %s1870_s26, %s1866_s25  ;;  %p2349_p1 = scmp.eq.s32.totalorder %s1985_s29, 0 }
  0x1c   : > { %p331_p2 = scmp.eq.s32.totalorder %s1985_s29, 1  ;;  %p337_p3 = scmp.eq.s32.totalorder %s1330_s30, 1 }
  0x1d   : > { %p1994_p4 = por %p2349_p1, %p61_p0  ;;  %p1331_p5 = scmp.ge.s32.totalorder %s1878_s28, 1 }
  0x1e   : > { %p1999_p6 = por %p337_p3, %p61_p0  ;;  %p370_p7 = scmp.lt.s32.totalorder %s1878_s28, 3 }
  0x1f   : > { %s2369_s4 = sld [smem:[#allocation35_spill]]  ;;  %s1880_s20 = smov [#allocation11]  }
  0x20   : > { %s2367_s15 = scalar_select %p1999_p6, 1, 0 }
  0x21   : > { %p2007_p8 = pnand %p1331_p5, %p370_p7  ;;  %s383_s21 = sshll.u32 %s1880_s20, 4  ;;  %s384_s21 = int_to_ptr.vmem [resolvable:$true] %s383_s21 }
  0x22   : > { %2368 = sst [smem:[#allocation30_spill]] %s2367_s15  ;;  %s2338_s16 = smov 128  }
  0x23   : > { %p1411_p9 = pneg %p2007_p8  ;;  %s2372_s5 = sld [smem:[#allocation36_spill]] }
  0x24   : > { %s2340_s17 = smov 8   ;;  %s1883_s20 = smov [#allocation12]  }
  0x25   : > { %s381_s18 = sshll.u32 %s2369_s4, 4  ;;  %p2015_p10 = pnand %p1411_p9, %p2349_p1  ;;  %s382_s18 = int_to_ptr.hbm [resolvable:$true] %s381_s18 }
  0x26   : > { %s397_s4 = sshll.u32 %s1883_s20, 4  ;;  %s2034_s23 = sadd.s32 1, %s1878_s28   ;;  %s398_s4 = int_to_ptr.vmem [resolvable:$true] %s397_s4 }
  0x27   : > { %1414 = dma.hbm_to_vmem [thread:$0]  (!%p2015_p10), %s382_s18, 512, %s384_s21, [#allocation10], %s2338_s16, %s2338_s16, %s2340_s17  }
  0x28   : > { %2373 = sst [smem:[#allocation31_spill]] %s2034_s23  ;;  %s48_s24 = sadd.s32 1, %s1874_s27 }
  0x29   : > { %s395_s30 = sshll.u32 %s2372_s5, 4  ;;  %s45_s5 = ssub.s32 %s1878_s28, %s2034_s23  ;;  %s396_s30 = int_to_ptr.hbm [resolvable:$true] %s395_s30 }
  0x2a   : > { %1417 = dma.hbm_to_vmem [thread:$0]  (!%p2015_p10), %s396_s30, 512, %s398_s4, [#allocation13], %s2338_s16, %s2338_s16, %s2340_s17  }
  0x2b   : > { %p55_p12 = scmp.ne.s32.totalorder %s1874_s27, %s1870_s26  ;;  %p46_p13 = scmp.eq.s32.totalorder %s45_s5, 0 }
  0x2c   : > { %p56_p0 = scmp.eq.s32.totalorder %s1878_s28, 0  ;;  %p1448_p5 = scmp.lt.s32.totalorder %s1878_s28, 2 }
  0x2d   : > { %p2044_p3 = por %p331_p2, %p55_p12  ;;  %s2053_s20 = sand.u32 1, %s1874_s27  }
  0x2e   : > { %s2050_s21 = scalar_select %p46_p13, %s1874_s27, %s48_s24  }
  0x2f   : > { %s2374_s18 = scalar_select %p2044_p3, 1, 0 }
  0x30   : > { %2376 = sst [smem:[#allocation33_spill]] %s2050_s21  ;;  %p57_p7 = por %p56_p0, %p55_p12 }
  0x31   : > { %2375 = sst [smem:[#allocation32_spill]] %s2374_s18  ;;  %s2350_s4 = sand.u32 1, %s1878_s28  }
  0x32   : > { %s2057_s30 = sshll.u32 %s2053_s20, 3  ;;  %p2059_p9 = pnand %p1448_p5, %p57_p7 }
  0x33   : > { %s2064_s16 = sshll.u32 %s1878_s28, 3  ;;  %s2378_s1 = sld [smem:[#allocation34_spill]] }
  0x34   : > { %s474_s23 = scalar_lea.vmem [#allocation6], %s2057_s30  ;;  %s2073_s25 = scalar_lea.sflag [#allocation7], %s2350_s4 }
  0x35   : > { %s482_s15 = sshll.u32 %s474_s23, 4  ;;  %p1584_p12 = pneg %p2059_p9  ;;  %s483_s15 = int_to_ptr.vmem [resolvable:$true] %s482_s15 }
  0x39   : > { %s478_s21 = scalar_lea.hbm %s2378_s1, %s2064_s16 }
  0x3a   : > { %s480_s27 = sshll.u32 %s478_s21, 4  ;;  %s1587_s21 = scalar_lea.hbm %s2378_s1, 16  ;;  %s481_s27 = int_to_ptr.hbm [resolvable:$true] %s480_s27 }
  0x3b   : > { %s1580_s11 = sshra.s32 %s481_s27, 4  ;;  %s1581_s11 = int_to_ptr.hbm [resolvable:$true] %s1580_s11 }
  0x3c   : > { %s1582_s12 = scalar_lea.hbm %s1581_s11, 8  ;;  %p1588_p5 = scmp.lt.s32.totalorder %s1581_s11, %s2378_s1 }
  0x3d   : > { %p1583_p2 = scmp.ne.s32.totalorder %s1581_s11, %s1582_s12  ;;  %p1589_p7 = scmp.lt.s32.totalorder %s1587_s21, %s1582_s12 }
  0x3f   : > { %p1585_p13 = pnand %p1584_p12, %p1583_p2  ;;  %p1590_p11 = por %p1589_p7, %p1588_p5 }
  0x41   : > { %p1586_p0 = pneg %p1585_p13 }
  0x43   : > { %p1591_p1 = pnand %p1590_p11, %p1586_p0 }
  0x45   : > { %1594 = shalt.err (!%p1591_p1)
}
  0x46   : > { %1430 = dma.hbm_to_vmem [thread:$0]  (!%p2059_p9), %s481_s27, 128, %s483_s15, %s2073_s25  }
  0x47   : > { %s2379_s6 = sld [smem:[#allocation37_spill]]  ;;  %s1884_s24 = smov [#allocation14]  }
  0x48   : > { %s411_s13 = sshll.u32 %s1884_s24, 4  ;;  %s2380_s7 = sld [smem:[#allocation38_spill]]  ;;  %s412_s13 = int_to_ptr.vmem [resolvable:$true] %s411_s13 }
  0x49   : > { %s2381_s23 = smov 8   ;;  %s2382_s1 = smov 128  }
  0x4a   : > { %s1885_s27 = smov [#allocation15]   ;;  %s1337_s18 = sshll.u32 %s2053_s20, 1 }
  0x4b   : > { %s425_s15 = sshll.u32 %s1885_s27, 4  ;;  %s1338_s4 = sshll.u32 %s1878_s28, 1  ;;  %s426_s15 = int_to_ptr.vmem [resolvable:$true] %s425_s15 }
  0x4c   : > { %s455_s24 = scalar_lea.vmem [#allocation3], %s1337_s18  ;;  %s497_s27 = scalar_lea.hbm %s2326_s2, %s2064_s16 }
  0x4d   : > { %s409_s17 = sshll.u32 %s2379_s6, 4  ;;  %s463_s11 = sshll.u32 %s455_s24, 4  ;;  %s410_s17 = int_to_ptr.hbm [resolvable:$true] %s409_s17  ;;  %s464_s11 = int_to_ptr.vmem [resolvable:$true] %s463_s11 }
  0x4e   : > { %s423_s21 = sshll.u32 %s2380_s7, 4  ;;  %s459_s7 = scalar_lea.hbm %s2324_s0, %s1338_s4  ;;  %s424_s21 = int_to_ptr.hbm [resolvable:$true] %s423_s21 }
  0x4f   : > { %1420 = dma.hbm_to_vmem [thread:$0]  (!%p2015_p10), %s410_s17, 512, %s412_s13, [#allocation13], %s2382_s1, %s2382_s1, %s2381_s23  }
  0x50   : > { %1423 = dma.hbm_to_vmem [thread:$0]  (!%p2015_p10), %s424_s21, 512, %s426_s15, [#allocation16], %s2382_s1, %s2382_s1, %s2381_s23  }
  0x51   : > { %s461_s10 = sshll.u32 %s459_s7, 4  ;;  %s452_s8 = scalar_lea.sflag [#allocation4], %s2053_s20  ;;  %s462_s10 = int_to_ptr.hbm [resolvable:$true] %s461_s10 }
  0x52   : > { %s1670_s22 = sshra.s32 %s462_s10, 4  ;;  %s1677_s6 = scalar_lea.hbm %s2324_s0, 4  ;;  %s1671_s22 = int_to_ptr.hbm [resolvable:$true] %s1670_s22 }
  0x53   : > { %s1672_s9 = scalar_lea.hbm %s1671_s22, 2  ;;  %p1678_p2 = scmp.lt.s32.totalorder %s1671_s22, %s2324_s0 }
  0x54   : > { %p1673_p1 = scmp.ne.s32.totalorder %s1671_s22, %s1672_s9  ;;  %p1679_p13 = scmp.lt.s32.totalorder %s1677_s6, %s1672_s9 }
  0x56   : > { %p1675_p10 = pnand %p1673_p1, %p1584_p12  ;;  %p1680_p0 = por %p1679_p13, %p1678_p2 }
  0x58   : > { %p1676_p11 = pneg %p1675_p10 }
  0x5a   : > { %p1681_p5 = pnand %p1680_p0, %p1676_p11 }
  0x5c   : > { %1684 = shalt.err (!%p1681_p5)
}
  0x5d   : > { %1427 = dma.hbm_to_vmem [thread:$0]  (!%p2059_p9), %s462_s10, 32, %s464_s11, %s452_s8  }
  0x5e   : > { %s499_s20 = sshll.u32 %s497_s27, 4  ;;  %s493_s15 = scalar_lea.vmem [#allocation8], %s2057_s30  ;;  %s500_s20 = int_to_ptr.hbm [resolvable:$true] %s499_s20 }
  0x5f   : > { %s501_s18 = sshll.u32 %s493_s15, 4  ;;  %s1700_s4 = sshra.s32 %s500_s20, 4  ;;  %s502_s18 = int_to_ptr.vmem [resolvable:$true] %s501_s18  ;;  %s1701_s4 = int_to_ptr.hbm [resolvable:$true] %s1700_s4 }
  0x60   : > { %s1702_s24 = scalar_lea.hbm %s1701_s4, 8  ;;  %s1707_s17 = scalar_lea.hbm %s2326_s2, 16 }
  0x61   : > { %p1703_p7 = scmp.ne.s32.totalorder %s1701_s4, %s1702_s24  ;;  %p1708_p11 = scmp.lt.s32.totalorder %s1701_s4, %s2326_s2 }
  0x62   : > { %p1709_p2 = scmp.lt.s32.totalorder %s1707_s17, %s1702_s24 }
  0x63   : > { %p1705_p1 = pnand %p1703_p7, %p1584_p12 }
  0x64   : > { %p1710_p13 = por %p1709_p2, %p1708_p11 }
  0x65   : > { %p1706_p10 = pneg %p1705_p1 }
  0x67   : > { %p1711_p0 = pnand %p1710_p13, %p1706_p10 }
  0x69   : > { %1714 = shalt.err (!%p1711_p0)
}
  0x6a   : > { %1433 = dma.hbm_to_vmem [thread:$0]  (!%p2059_p9), %s500_s20, 128, %s502_s18, %s2073_s25  }
  0x6b   : > { %s516_s11 = scalar_lea.hbm %s2327_s3, %s2064_s16  ;;  %s512_s1 = scalar_lea.vmem [#allocation9], %s2057_s30 }
  0x6c   : > { %s518_s27 = sshll.u32 %s516_s11, 4  ;;  %s520_s21 = sshll.u32 %s512_s1, 4  ;;  %s519_s27 = int_to_ptr.hbm [resolvable:$true] %s518_s27  ;;  %s521_s21 = int_to_ptr.vmem [resolvable:$true] %s520_s21 }
  0x6d   : > { %s2383_s6 = sand.u32 1, %s1878_s28   ;;  %s1730_s7 = sshra.s32 %s519_s27, 4  ;;  %s1731_s7 = int_to_ptr.hbm [resolvable:$true] %s1730_s7 }
  0x6e   : > { %s509_s23 = scalar_lea.sflag [#allocation10], %s2383_s6  ;;  %s1732_s15 = scalar_lea.hbm %s1731_s7, 8 }
  0x6f   : > { %p1733_p5 = scmp.ne.s32.totalorder %s1731_s7, %s1732_s15  ;;  %s1737_s18 = scalar_lea.hbm %s2327_s3, 16 }
  0x70   : > { %p1738_p10 = scmp.lt.s32.totalorder %s1731_s7, %s2327_s3  ;;  %p1739_p11 = scmp.lt.s32.totalorder %s1737_s18, %s1732_s15 }
  0x71   : > { %p1735_p7 = pnand %p1733_p5, %p1584_p12 }
  0x72   : > { %p1740_p2 = por %p1739_p11, %p1738_p10 }
  0x73   : > { %p1736_p1 = pneg %p1735_p7 }
  0x75   : > { %p1741_p13 = pnand %p1740_p2, %p1736_p1 }
  0x77   : > { %1744 = shalt.err (!%p1741_p13)
}
  0x78   : > { %1436 = dma.hbm_to_vmem [thread:$0]  (!%p2059_p9), %s519_s27, 128, %s521_s21, %s509_s23  }
  0x79   : > { %529 = sbr.rel (%p2007_p8) target bundleno = 1189 (0x4a5), region = 68  ;;  %s2160_s30 = sand.u32 (!%p2007_p8), 1, %s1870_s26  }
  0x7a   : > { %s1346_s24 = sshll.u32 (!%p2007_p8), %s2160_s30, 1  ;;  %s532_s9 = scalar_lea.sflag (!%p2007_p8), [#allocation4], %s2160_s30 }
  0x7b   : > { %s2164_s12 = scalar_lea.vmem (!%p2007_p8), [#allocation3], %s1346_s24 }
  0x7e   : > { %1833 = dma.done.wait (%p1994_p4), %s532_s9, 32  }
  0x7f   : > { %1835 = vsyncadd (%p1994_p4), %s532_s9, 4294967264  ;;  %s541_s19 = sand.u32 1, %s1985_s29   ;;  %s2172_s5 = sshll.u32 %s2160_s30, 3 }
  0x80   : > { %s542_s17 = scalar_lea.sflag [#allocation7], %s541_s19  ;;  %s545_s13 = scalar_lea.vmem [#allocation6], %s2172_s5 }
  0x81   : > { %1837 = dma.done.wait (%p1994_p4), %s542_s17, 256  }
  0x82   : > { %1839 = vsyncadd (%p1994_p4), %s542_s17, 4294967040  ;;  %s555_s22 = scalar_lea.vmem [#allocation8], %s2172_s5  ;;  %s562_s8 = scalar_lea.sflag [#allocation10], %s541_s19 }
  0x83   : > { %s565_s10 = scalar_lea.vmem [#allocation9], %s2172_s5 }
  0x84   : > { %1841 = dma.done.wait (%p1994_p4), %s562_s8, 128  }
  0x85   : > { %1843 = vsyncadd (%p1994_p4), %s562_s8, 4294967168  ;;  %p2384_p8 = scmp.eq.s32.totalorder %s1985_s29, 0 }
  0x87   : > { %1845 = dma.done.wait (%p2384_p8), [#allocation10], 512   ;;  %p2385_p9 = pmov %p2384_p8 }
  0x88   : > { %p2386_p12 = pmov %p2384_p8 }
  0x89   : > { %1847 = vsyncadd (%p2385_p9), [#allocation10], 4294966784 }
  0x8a   : > { %1849 = dma.done.wait (%p2386_p12), [#allocation13], 1024   ;;  %p2387_p0 = pmov %p2384_p8 }
  0x8c   : > { %1851 = vsyncadd (%p2387_p0), [#allocation13], 4294966272  ;;  %p2388_p5 = pmov %p2387_p0 }
  0x8d   : > { %p2389_p7 = pmov %p2387_p0 }
  0x8e   : > { %1853 = dma.done.wait (%p2388_p5), [#allocation16], 512  }
  0x8f   : > { %1855 = vsyncadd (%p2389_p7), [#allocation16], 4294966784  ;;  %v688_v0 = vld [vmem:[#allocation12 + $0x18] sm:$0xff]  ;;  %v687_v1 = vld [vmem:[#allocation12 + $0x10] sm:$0xff]  ;;  %vm660_vm0 = vcmask 261120   ;;  %s2390_s27 = sld [smem:[#allocation40_spill]] }
  0x90   : > { %v655_v2 = vld [vmem:[#allocation11 + $0x18] sm:$0xff]  ;;  %708 = vmatpush.msra.mxu1 %v688_v0  ;;  %v654_v3 = vld [vmem:[#allocation11 + $0x10] sm:$0xff]  ;;  %v686_v4 = vld [vmem:[#allocation12 + $0x8] sm:$0xff]  ;;  %s2391_s6 = sld [smem:[#allocation39_spill]]  ;;  %vm750_vm1 = vcmask 64512   ;;  %s1886_s23 = smov 104  }
  0x91   : > { %676 = vmatpush.msra.mxu0 %v655_v2  ;;  %v653_v5 = vld [vmem:[#allocation11 + $0x8] sm:$0xff]  ;;  %v685_v6 = vld [vmem:[#allocation12] sm:$0xff]  ;;  %v651_v9 = vld [vmem:[%s545_s13] sm:$0xff]  ;;  %s1887_s7 = smov 120   ;;  %s1888_s15 = smov 112   ;;  %v1889_v27 = vmov 0  }
  0x92   : > { %709 = vmatpush.msra.mxu1 %v687_v1  ;;  %v652_v7 = vld [vmem:[#allocation11] sm:$0xff]  ;;  %v720_v16 = vld [vmem:[#allocation14 + $0x18] sm:$0xff]  ;;  %v719_v17 = vld [vmem:[#allocation14 + $0x10] sm:$0xff]  ;;  %s2394_s18 = sld [smem:[#allocation41_spill]]  ;;  %s1355_s16 = sshll.u32 %s2160_s30, 5  ;;  %vm896_vm4 = vcmask 130112  }
  0x93   : > { %677 = vmatpush.msra.mxu0 %v654_v3  ;;  %v684_v8 = vld [vmem:[%s555_s22] sm:$0xff]  ;;  %740 = vmatpush.msra.mxu2 %v720_v16  ;;  %v716_v20 = vld [vmem:[%s565_s10] sm:$0xff]  ;;  %s2249_s4 = scalar_lea.vmem [#allocation18], %s1355_s16  ;;  %s1890_s24 = smov 8   ;;  %vm973_vm5 = vcmask 195712   ;;  %vm1050_vm6 = vcmask 261312  }
  0x94   : > { %710 = vmatpush.msra.mxu1 %v686_v4  ;;  %v718_v18 = vld [vmem:[#allocation14 + $0x8] sm:$0xff]  ;;  %v717_v19 = vld [vmem:[#allocation14] sm:$0xff]  ;;  %s1891_s9 = smov 16   ;;  %s1382_s17 = sshll.u32 %s1985_s29, 5 }
  0x95   : > { %678 = vmatpush.msra.mxu0 %v653_v5  ;;  %v1500_v10 = vld [vmem:[%s2390_s27] ss:$0 sm:$0xff]  ;;  %741 = vmatpush.msra.mxu2 %v719_v17  ;;  %v748_v24 = vld [vmem:[%s2164_s12] sm:$0x3]  ;;  %s1892_s12 = smov 24   ;;  %s2396_s8 = sld [smem:[#allocation44_spill]] }
  0x96   : > { %711 = vmatpush.msra.mxu1 %v685_v6  ;;  %v1501_v11 = vld [vmem:[%s2391_s6] ss:$0 sm:$0xff]  ;;  %vm749_vm2 = vnez %v748_v24  ;;  %s1117_s14 = sshll.u32 %s2249_s4, 4  ;;  %s1091_s27 = scalar_lea.sflag [#allocation19], %s2160_s30  ;;  %s1118_s14 = int_to_ptr.vmem [resolvable:$true] %s1117_s14 }
  0x97   : > { %679 = vmatpush.msra.mxu0 %v652_v7  ;;  %1357 = vmatmul.msk.f32.vlgmr.msra.gmra.mxu1 %vm660_vm0, %v684_v8  ;;  %v777_v28 = vsel %vm749_vm2, 16843009, %v1889_v27 }
  0x98   : > { %1356 = vmatmul.msk.f32.vlgmr.msra.gmra.mxu0 %vm660_vm0, %v651_v9  ;;  %742 = vmatpush.msra.mxu2 %v718_v18  ;;  %v778_v29 = vunpack.c.0.s8 %v777_v28  ;;  %v1502_v35 = vld [vmem:[%s2394_s18] ss:$0 sm:$0xff] }
  0x9a   : > { %743 = vmatpush.msra.mxu2 %v717_v19  ;;  %vm2225_vm3 = vcmp.ne.s32.totalorder %v778_v29, 0 }
  0x9b   : > { %1358 = vmatmul.msk.f32.vlgmr.msra.gmra.mxu2 %vm660_vm0, %v716_v20  ;;  %s1116_s10 = scalar_lea.hbm %s2396_s8, %s1382_s17 }
  0x9c   : > { %s1119_s11 = sshll.u32 %s1116_s10, 4  ;;  %s1120_s11 = int_to_ptr.hbm [resolvable:$true] %s1119_s11 }
  0x9d   : > { %s1774_s1 = sshra.s32 %s1120_s11, 4  ;;  %s1775_s1 = int_to_ptr.hbm [resolvable:$true] %s1774_s1 }
  0x9e   : > { %s1776_s21 = scalar_lea.hbm %s1775_s1, 32  ;;  %p1781_p11 = scmp.lt.s32.totalorder %s1775_s1, %s2396_s8 }
  0x9f   : > { %p1777_p4 = scmp.ne.s32.totalorder %s1775_s1, %s1776_s21 }
  0xa1   : > { %p1778_p1 = pnand %p1777_p4, %p2044_p3 }
  0xa3   : > { %p1779_p10 = pneg %p1778_p1 }
 0x114   : > { %v713_v12 = vpop.f32.mrf.mxu1 }
 0x115   : > { %v681_v13 = vpop.f32.mrf.mxu0  ;;  %v714_v14 = vadd.f32 %v1500_v10, %v713_v12 }
 0x116   : > { %v682_v15 = vadd.f32 %v1501_v11, %v681_v13 }
 0x117   : > { %977 = vrot.lane.b32.xlu2 %v714_v14, %s1886_s23  ;;  %822 = vrot.lane.b32.xlu1 %v714_v14, %s1887_s7 }
 0x118   : > { %900 = vrot.lane.b32.xlu0 %v714_v14, %s1888_s15  ;;  %1359 = vmatpush.xpose.msk.msra.mxu3 %vm750_vm1, %v714_v14 }
 0x11b   : > { %1360 = vmatmul.msk.f32.vlgmr.msra.gmra.mxu3 %vm750_vm1, %v682_v15 }
 0x11e   : > { %v745_v36 = vpop.f32.mrf.mxu2 }
 0x11f   : > { %975 = vrot.lane.b32.xlu2 %v682_v15, %s1886_s23  ;;  %820 = vrot.lane.b32.xlu1 %v682_v15, %s1887_s7  ;;  %v746_v37 = vadd.f32 %v1502_v35, %v745_v36  ;;  %v1055_v35 = vld [vmem:[#allocation15 + $0x10] sm:$0xff]  ;;  %v1054_v36 = vld [vmem:[#allocation15 + $0x8] sm:$0xff] }
 0x120   : > { %898 = vrot.lane.b32.xlu0 %v682_v15, %s1888_s15 }
 0x121   : > { %814 = vmatpush.msrb.mxu3 %v746_v37 }
 0x171   : > { %v978_v22 = vpop.permute.xlu2 %977 }
 0x179   : > { %v976_v30 = vpop.permute.xlu2 %975 }
 0x189   : > { %v823_v21 = vpop.permute.xlu1 %822 }
 0x18a   : > { %v901_v23 = vpop.permute.xlu0 %900  ;;  %1362 = vmatpush.xpose.msk.msrb.mxu0 %vm750_vm1, %v823_v21 }
 0x18b   : > { %1366 = vmatpush.xpose.msk.msrb.mxu2 %vm750_vm1, %v901_v23 }
 0x18e   : > { %1370 = vmatpush.xpose.msk.msra.mxu0 %vm750_vm1, %v978_v22 }
 0x191   : > { %v821_v25 = vpop.permute.xlu1 %820 }
 0x192   : > { %v899_v26 = vpop.permute.xlu0 %898  ;;  %1363 = vmatmul.msk.f32.vlgmr.msrb.gmra.mxu0 %vm750_vm1, %v821_v25 }
 0x193   : > { %1367 = vmatmul.msk.f32.vlgmr.msrb.gmra.mxu2 %vm750_vm1, %v899_v26 }
 0x19a   : > { %1371 = vmatmul.msk.f32.vlgmr.msra.gmra.mxu0 %vm750_vm1, %v976_v30 }
 0x19e   : > { %v774_v32 = vpop.f32.mrf.mxu3 }
 0x19f   : > { %v780_v33 = vsel %vm2225_vm3, -1e+09, %v774_v32 }
 0x1a0   : > { %v781_v34 = vsel %vm750_vm1, %v780_v33, -inf }
 0x1a1   : > { %782 = vmax.xlane.f32.xlu0 %v781_v34  ;;  %v1056_v34 = vld [vmem:[#allocation15 + $0x18] sm:$0xff] }
 0x1a2   : > { %1076 = vmatpush.msra.mxu2 %v1056_v34 }
 0x1a4   : > { %1077 = vmatpush.msra.mxu2 %v1055_v35 }
 0x1a6   : > { %1078 = vmatpush.msra.mxu2 %v1054_v36 }
 0x20f   : > { %v845_v38 = vpop.f32.mrf.mxu0 }
 0x210   : > { %v848_v39 = vsel %vm2225_vm3, -1e+09, %v845_v38 }
 0x211   : > { %v849_v40 = vsel %vm750_vm1, %v848_v39, -inf }
 0x212   : > { %850 = vmax.xlane.f32.xlu1 %v849_v40 }
 0x214   : > { %v783_v41 = vpop.xlane.xlu0 %782 }
 0x215   : > { %v784_v42 = vsub.f32 %v780_v33, %v783_v41 }
 0x216   : > { %v923_v43 = vpop.f32.mrf.mxu2 }
 0x217   : > { %v785_v44 = vmul.f32 1.442695, %v784_v42  ;;  %v926_v45 = vsel %vm2225_vm3, -1e+09, %v923_v43  ;;  %v1000_v47 = vpop.f32.mrf.mxu0 }
 0x218   : > { %v927_v46 = vsel %vm750_vm1, %v926_v45, -inf  ;;  %v1003_v48 = vsel %vm2225_vm3, -1e+09, %v1000_v47 }
 0x219   : > { %1504 = vpow2.f32 %v785_v44  ;;  %928 = vmax.xlane.f32.xlu2 %v927_v46  ;;  %v1004_v50 = vsel %vm750_vm1, %v1003_v48, -inf }
 0x21f   : > { %v1505_v49 = vpop.eup %1504 }
 0x220   : > { %v787_v51 = vsel %vm750_vm1, %v1505_v49, 0.0 }
 0x221   : > { %1005 = vmax.xlane.f32.xlu2 %v1004_v50  ;;  %788 = vadd.xlane.f32.xlu0 %v787_v51 }
 0x285   : > { %v851_v52 = vpop.xlane.xlu1 %850 }
 0x286   : > { %v852_v53 = vsub.f32 %v848_v39, %v851_v52 }
 0x288   : > { %v853_v54 = vmul.f32 1.442695, %v852_v53 }
 0x28a   : > { %1506 = vpow2.f32 %v853_v54 }
 0x28c   : > { %v929_v55 = vpop.xlane.xlu2 %928 }
 0x28d   : > { %v930_v56 = vsub.f32 %v926_v45, %v929_v55 }
 0x28f   : > { %v931_v57 = vmul.f32 1.442695, %v930_v56 }
 0x290   : > { %v1507_v58 = vpop.eup %1506 }
 0x291   : > { %1508 = vpow2.f32 %v931_v57  ;;  %v855_v59 = vsel %vm750_vm1, %v1507_v58, 0.0 }
 0x292   : > { %856 = vadd.xlane.f32.xlu1 %v855_v59 }
 0x294   : > { %v1006_v60 = vpop.xlane.xlu2 %1005  ;;  %v789_v61 = vpop.xlane.xlu0 %788 }
 0x295   : > { %v1007_v62 = vsub.f32 %v1003_v48, %v1006_v60  ;;  %1510 = vrcp.f32 %v789_v61 }
 0x297   : > { %v1509_v63 = vpop.eup %1508  ;;  %v1008_v0 = vmul.f32 1.442695, %v1007_v62 }
 0x298   : > { %v933_v1 = vsel %vm750_vm1, %v1509_v63, 0.0 }
 0x299   : > { %1512 = vpow2.f32 %v1008_v0  ;;  %934 = vadd.xlane.f32.xlu2 %v933_v1 }
 0x29b   : > { %v1511_v2 = vpop.eup %1510 }
 0x29c   : > { %v791_v3 = vmul.f32 %v1511_v2, %v789_v61 }
 0x29e   : > { %v792_v4 = vsub.f32 2.0, %v791_v3 }
 0x29f   : > { %v1513_v5 = vpop.eup %1512 }
 0x2a0   : > { %v793_v6 = vmul.f32 %v1511_v2, %v792_v4  ;;  %v1010_v7 = vsel %vm750_vm1, %v1513_v5, 0.0 }
 0x2a1   : > { %1011 = vadd.xlane.f32.xlu0 %v1010_v7 }
 0x2a2   : > { %v794_v8 = vmul.f32 %v1505_v49, %v793_v6 }
 0x2a4   : > { %795 = vst.msk [vmem:[%s2249_s4] sm:$0xff] %vm750_vm1, %v794_v8  ;;  %1361 = vmatmul.msk.f32.vlgmr.msrb.gmra.mxu3 %vm750_vm1, %v794_v8 }
 0x2ab   : > { %866 = vrot.lane.b32.xlu1 %v746_v37, %s1887_s7  ;;  %s1780_s7 = scalar_lea.hbm %s2396_s8, 64 }
 0x2ac   : > { %p1782_p2 = scmp.lt.s32.totalorder %s1780_s7, %s1776_s21 }
 0x2ae   : > { %p1783_p13 = por %p1782_p2, %p1781_p11 }
 0x2b0   : > { %p1784_p8 = pnand %p1783_p13, %p1779_p10 }
 0x2b1   : > { %943 = vrot.lane.b32.xlu2 %v746_v37, %s1888_s15 }
 0x2b5   : > { %1020 = vrot.lane.b32.xlu0 %v746_v37, %s1886_s23  ;;  %v1053_v37 = vld [vmem:[#allocation15] sm:$0xff] }
 0x2b6   : > { %1079 = vmatpush.msra.mxu2 %v1053_v37 }
 0x305   : > { %v857_v9 = vpop.xlane.xlu1 %856 }
 0x306   : > { %1514 = vrcp.f32 %v857_v9 }
 0x30c   : > { %v1515_v10 = vpop.eup %1514  ;;  %v935_v11 = vpop.xlane.xlu2 %934 }
 0x30d   : > { %v859_v12 = vmul.f32 %v1515_v10, %v857_v9  ;;  %1516 = vrcp.f32 %v935_v11 }
 0x30f   : > { %v860_v13 = vsub.f32 2.0, %v859_v12 }
 0x311   : > { %v861_v14 = vmul.f32 %v1515_v10, %v860_v13 }
 0x313   : > { %v1517_v15 = vpop.eup %1516  ;;  %v862_v16 = vmul.f32 %v1507_v58, %v861_v14 }
 0x314   : > { %v937_v17 = vmul.f32 %v1517_v15, %v935_v11  ;;  %v944_v18 = vpop.permute.xlu2 %943  ;;  %v1012_v19 = vpop.xlane.xlu0 %1011 }
 0x315   : > { %1364 = vst.msk [vmem:[%s2249_s4 + $0x8] sm:$0xff] %vm750_vm1, %v862_v16  ;;  %1518 = vrcp.f32 %v1012_v19  ;;  %964 = vmatpush.msra.mxu3 %v944_v18 }
 0x316   : > { %v938_v20 = vsub.f32 2.0, %v937_v17 }
 0x318   : > { %v939_v21 = vmul.f32 %v1517_v15, %v938_v20 }
 0x31a   : > { %v940_v22 = vmul.f32 %v1509_v63, %v939_v21 }
 0x31b   : > { %v1519_v23 = vpop.eup %1518 }
 0x31c   : > { %1368 = vst.msk [vmem:[%s2249_s4 + $0x10] sm:$0xff] %vm750_vm1, %v940_v22  ;;  %v1014_v24 = vmul.f32 %v1519_v23, %v1012_v19  ;;  %1369 = vmatmul.msk.f32.vlgmr.msra.gmra.mxu3 %vm750_vm1, %v940_v22 }
 0x31d   : > { %v867_v25 = vpop.permute.xlu1 %866 }
 0x31e   : > { %v1015_v26 = vsub.f32 2.0, %v1014_v24  ;;  %887 = vmatpush.msrb.mxu1 %v867_v25 }
 0x31f   : > { %1365 = vmatmul.msk.f32.vlgmr.msrb.gmra.mxu1 %vm750_vm1, %v862_v16 }
 0x320   : > { %v1016_v27 = vmul.f32 %v1519_v23, %v1015_v26 }
 0x322   : > { %v1017_v28 = vmul.f32 %v1513_v5, %v1016_v27 }
 0x324   : > { %1372 = vst.msk [vmem:[%s2249_s4 + $0x18] sm:$0xff] %vm750_vm1, %v1017_v28 }
 0x327   : > { %v816_v29 = vpop.f32.mrf.mxu3  ;;  %v1021_v30 = vpop.permute.xlu0 %1020 }
 0x328   : > { %819 = vst.msk [vmem:[#allocation2] sm:$0xff] %vm750_vm1, %v816_v29  ;;  %1041 = vmatpush.msra.mxu1 %v1021_v30 }
 0x329   : > { %1373 = vmatmul.msk.f32.vlgmr.msra.gmra.mxu1 %vm750_vm1, %v1017_v28 }
 0x39c   : > { %v889_v31 = vpop.f32.mrf.mxu1 }
 0x39d   : > { %893 = vrot.lane.b32.xlu1 %v889_v31, %s1890_s24 }
 0x39f   : > { %v966_v32 = vpop.f32.mrf.mxu3 }
 0x3a0   : > { %970 = vrot.lane.b32.xlu0 %v966_v32, %s1891_s9 }
 0x3a6   : > { %v1043_v33 = vpop.f32.mrf.mxu1 }
 0x3a7   : > { %1047 = vrot.lane.b32.xlu2 %v1043_v33, %s1892_s12 }
 0x401   : > { %v1048_v40 = vpop.permute.xlu2 %1047 }
 0x40f   : > { %v894_v38 = vpop.permute.xlu1 %893 }
 0x410   : > { %897 = vst.msk [vmem:[#allocation2] sm:$0xff] %vm896_vm4, %v894_v38 }
 0x412   : > { %v971_v39 = vpop.permute.xlu0 %970 }
 0x413   : > { %974 = vst.msk [vmem:[#allocation2] sm:$0xff] %vm973_vm5, %v971_v39 }
 0x414   : > { %1051 = vst.msk [vmem:[#allocation2] sm:$0xff] %vm1050_vm6, %v1048_v40 }
 0x41b   : > { %v1052_v41 = vld [vmem:[#allocation2] sm:$0xff] }
 0x41c   : > { %1374 = vmatmul.msk.f32.vlgmr.msra.gmra.mxu2 %vm660_vm0, %v1052_v41 }
 0x41d   : > { %1787 = shalt.err (!%p1784_p8)
}
 0x41e   : > { %s1893_s20 = smov 128   ;;  %s1377_s18 = sshll.u32 %s1985_s29, 3 }
 0x41f   : > { %1408 = dma.vmem_to_hbm [thread:$0]  (%p2044_p3), %s1118_s14, 512, %s1120_s11, %s1091_s27, %s1893_s20, %s1893_s20, %s1890_s24  }
 0x420   : > { %s2397_s9 = sld [smem:[#allocation43_spill]]  ;;  %s641_s10 = scalar_lea.vmem [#allocation17], %s2172_s5 }
 0x421   : > { %s2398_s22 = sld [smem:[#allocation42_spill]]  ;;  %s1103_s1 = sshll.u32 %s641_s10, 4  ;;  %s1104_s1 = int_to_ptr.vmem [resolvable:$true] %s1103_s1 }
 0x422   : > { %s1086_s24 = scalar_lea.sflag [#allocation5], %s2160_s30 }
 0x426   : > { %s1101_s12 = scalar_lea.hbm %s2397_s9, %s1377_s18  ;;  %s1808_s5 = scalar_lea.hbm %s2397_s9, 16 }
 0x427   : > { %v1503_v42 = vld [vmem:[%s2398_s22] ss:$0 sm:$0xff]  ;;  %s1105_s21 = sshll.u32 %s1101_s12, 4  ;;  %s1106_s21 = int_to_ptr.hbm [resolvable:$true] %s1105_s21 }
 0x428   : > { %s1802_s29 = sshra.s32 %s1106_s21, 4  ;;  %s1803_s29 = int_to_ptr.hbm [resolvable:$true] %s1802_s29 }
 0x429   : > { %s1804_s14 = scalar_lea.hbm %s1803_s29, 8  ;;  %p1809_p5 = scmp.lt.s32.totalorder %s1803_s29, %s2397_s9 }
 0x42a   : > { %p1805_p9 = scmp.ne.s32.totalorder %s1803_s29, %s1804_s14  ;;  %p1810_p7 = scmp.lt.s32.totalorder %s1808_s5, %s1804_s14 }
 0x42c   : > { %p1806_p12 = pnand %p1805_p9, %p2044_p3  ;;  %p1811_p4 = por %p1810_p7, %p1809_p5 }
 0x42e   : > { %p1807_p0 = pneg %p1806_p12 }
 0x430   : > { %p1812_p1 = pnand %p1811_p4, %p1807_p0 }
 0x49f   : > { %v1081_v43 = vpop.f32.mrf.mxu2 }
 0x4a0   : > { %v1082_v44 = vadd.f32 %v1503_v42, %v1081_v43 }
 0x4a2   : > { %1084 = vst.msk [vmem:[%s641_s10] sm:$0xff] %vm660_vm0, %v1082_v44 }
 0x4a3   : > { %1815 = shalt.err (!%p1812_p1)
}
 0x4a4   : > { %1407 = dma.vmem_to_hbm [thread:$0]  (%p2044_p3), %s1104_s1, 128, %s1106_s21, %s1086_s24  }
 0x4a5 PF: > { %s2399_s30 = sld [smem:[#allocation28_spill]]  ;;  %p2401_p10 = scmp.ge.s32.totalorder %s1878_s28, 2 }
 0x4a7   : > { %p1438_p11 = pnand %p2401_p10, %p1999_p6 }
 0x4a9   : > { %p1439_p2 = pneg %p1438_p11 }
 0x4ab   : > { %s1134_s15 = sand.u32 1, %s2399_s30  }
 0x4ac   : > { %s1135_s25 = scalar_lea.sflag [#allocation5], %s1134_s15 }
 0x4ad   : > { %1857 = dma.done.wait (%p1439_p2), %s1135_s25, 128  }
 0x4ae   : > { %1859 = vsyncadd (%p1439_p2), %s1135_s25, 4294967168  ;;  %s1145_s20 = scalar_lea.sflag [#allocation19], %s1134_s15 }
 0x4af   : > { %1861 = dma.done.wait (%p1439_p2), %s1145_s20, 512  }
 0x4b0   : > { %1863 = vsyncadd (%p1439_p2), %s1145_s20, 4294966784  ;;  %s2402_s28 = sld [smem:[#allocation31_spill]]  ;;  %s2405_s25 = smov %s1870_s26 }
 0x4b1   : > { %s2403_s18 = sld [smem:[#allocation29_spill]] }
 0x4b2   : > { %s2404_s27 = sld [smem:[#allocation33_spill]] }
 0x4b6   : > { %p38_p3 = scmp.ge.s32.totalorder %s2402_s28, 4  }
 0x4b7   : > { %s2406_s26 = smov %s2403_s18 }
 0x4b8   :  { %40 = sbr.rel (!%p38_p3) target bundleno = 25 (0x19), region = 186 }
 0x4bd   :  { %1151 = vsyncpa [#allocation4], 1 }
 0x4be   :  { %1153 = vsyncpa [#allocation4 + $0x1], 1 }
 0x4bf   :  { %1154 = vsyncpa [#allocation7], 1 }
 0x4c0   :  { %1156 = vsyncpa [#allocation7 + $0x1], 1 }
 0x4c1   :  { %1157 = vsyncpa [#allocation10], 1 }
 0x4c2   :  { %1159 = vsyncpa [#allocation10 + $0x1], 1 }
 0x4c3   :  { %1160 = vsyncpa [#allocation13], 1 }
 0x4c4   :  { %1161 = vsyncpa [#allocation16], 1 }
 0x4c5   :  { %1162 = vsyncpa [#allocation5], 1 }
 0x4c6   :  { %1164 = vsyncpa [#allocation5 + $0x1], 1 }
 0x4c7   :  { %1165 = vsyncpa [#allocation19], 1 }
 0x4c8   :  { %1167 = vsyncpa [#allocation19 + $0x1], 1 }

</bundles_post_ra>
